<compile_context>
chip_gen: v5e
topology: v5e:2x2
jax: 0.10.0
libtpu: 0.0.40
codegen_flags: <defaults>
</compile_context>

<pallas_src>
import jax
import jax.numpy as jnp
from jax.experimental import pallas as pl
from jax.experimental.pallas import tpu as pltpu


def _round_up(n, m):
    return ((n + m - 1) // m) * m


def _pick_row_tile(n_rows, block_rows, align):
    """Pick a row-tile size.

    Prefers (a) tiles that divide n_rows exactly (no pad/slice HBM pass),
    (b) >= 2 tiles so the 'parallel' axis can be sharded across TensorCores,
    (c) the largest such tile <= block_rows (amortize ~0.35us/step overhead).
    Falls back to padding when n_rows has no usable divisor.
    """
    best = None
    hi = min(block_rows, n_rows)
    for tm in range(align, hi + 1, align):
        if n_rows % tm:
            continue
        if n_rows >= 2 * align and n_rows // tm < 2:
            continue
        best = tm
    if best is not None:
        return best, n_rows
    tm = min(block_rows, _round_up(n_rows, align))
    if n_rows > align and _round_up(n_rows, tm) // tm < 2:
        tm = max(align, _round_up((n_rows + 1) // 2, align))
    return tm, _round_up(n_rows, tm)


def _pick_h_tile(C, H, tm, out_bytes, budget_bytes):
    """Full H if the resident footprint fits the VMEM budget, otherwise stream
    the weights in 128-aligned slabs (with an f32 accumulator in the kernel)."""

    def footprint(th, n_h):
        wbuf = 1 if n_h == 1 else 2               # weight slab buffering
        w = 2 * C * th * 2 * wbuf                 # W1 + W2 slabs (bf16)
        b = th * 4 * wbuf + C * 4                 # b1 slab + b2 (f32)
        io = 2 * tm * C * 4 + 2 * tm * C * out_bytes   # x / out double-buffered
        acc = tm * C * 4                          # f32 accumulator scratch
        interm = tm * th * (4 + 2)                # f32 hidden + bf16 copy
        return w + b + io + acc + interm

    if footprint(H, 1) <= budget_bytes:
        return H
    divisors = [d for d in range(128, H, 128) if H % d == 0]
    for th in sorted(divisors, reverse=True):
        if footprint(th, H // th) <= budget_bytes:
            return th
    return divisors[0] if divisors else H


def _ffn_kernel(x_ref, w1_ref, b1_ref, w2_ref, b2_ref, o_ref, acc_ref):
    # x_ref:(TM,C)  w1_ref:(C,TH) bf16  b1_ref:(1,TH) f32
    # w2_ref:(TH,C) bf16  b2_ref:(1,C) f32  o_ref:(TM,C)  acc_ref:(TM,C) f32
    h_step = pl.program_id(1)

    @pl.when(h_step == 0)
    def _():
        acc_ref[...] = jnp.zeros_like(acc_ref)

    # bf16 MXU inputs (native on v5e/v6e/v7x), f32 accumulation.
    x = x_ref[...].astype(jnp.bfloat16)
    h = jnp.dot(x, w1_ref[...], preferred_element_type=jnp.float32)
    h = jnp.maximum(h + b1_ref[...], 0.0)          # bias + ReLU in f32
    acc_ref[...] += jnp.dot(h.astype(jnp.bfloat16), w2_ref[...],
                            preferred_element_type=jnp.float32)

    @pl.when(h_step == pl.num_programs(1) - 1)
    def _():
        o_ref[...] = (acc_ref[...] + b2_ref[...]).astype(o_ref.dtype)


def feedforward(x, w1, b1, w2, b2, *, block_rows=512, vmem_budget_bytes=40 << 20):
    """x: (..., C); w1: (C, H); b1: (1, H); w2: (H, C); b2: (1, C)."""
    orig_shape = x.shape
    C = orig_shape[-1]
    H = w1.shape[1]
    assert w1.shape == (C, H) and w2.shape == (H, C)
    assert b1.shape == (1, H) and b2.shape == (1, C)

    x2 = x.reshape(-1, C)
    N = x2.shape[0]
    out_bytes = jnp.dtype(x.dtype).itemsize
    row_align = 8 if out_bytes >= 4 else (16 if out_bytes == 2 else 32)

    tm, n_pad = _pick_row_tile(N, block_rows, row_align)
    if n_pad != N:
        # TODO(synk): a masked ragged-tail tile would avoid this extra HBM pass.
        x2 = jnp.pad(x2, ((0, n_pad - N), (0, 0)))

    th = _pick_h_tile(C, H, tm, out_bytes, vmem_budget_bytes)
    n_h = H // th

    # bf16 weights: half the DMA bytes and half the resident-VMEM footprint.
    w1b = w1.astype(jnp.bfloat16)
    w2b = w2.astype(jnp.bfloat16)
    b1f = b1.astype(jnp.float32)
    b2f = b2.astype(jnp.float32)

    # Explicit VMEM limit from the real footprint (+ headroom), conservatively
    # assuming double-buffered weight slabs.
    est = (2 * C * th * 2 * 2 + th * 4 * 2 + C * 4
           + 2 * tm * C * 4 + 2 * tm * C * out_bytes
           + tm * C * 4 + tm * th * (4 + 2))
    vmem_limit = min(max(int(est * 1.5) + (8 << 20), 16 << 20), 100 << 20)

    def make_specs(use_buffered):
        # Blocks whose index_map is constant over the whole grid only need a
        # single VMEM buffer.
        const_mode = pl.Buffered(1) if use_buffered else None
        w_mode = pl.Buffered(1) if (use_buffered and n_h == 1) else None

        def spec(shape, imap, mode=None):
            if mode is None:
                return pl.BlockSpec(shape, imap)
            return pl.BlockSpec(shape, imap, pipeline_mode=mode)

        in_specs = [
            spec((tm, C), lambda i, h: (i, 0)),              # x row tile (reused across h)
            spec((C, th), lambda i, h: (0, h), w_mode),      # W1 slab
            spec((1, th), lambda i, h: (0, h), w_mode),      # b1 slab
            spec((th, C), lambda i, h: (h, 0), w_mode),      # W2 slab
            spec((1, C), lambda i, h: (0, 0), const_mode),   # b2 (constant)
        ]
        out_spec = pl.BlockSpec((tm, C), lambda i, h: (i, 0))
        return in_specs, out_spec

    def run(use_buffered):
        in_specs, out_spec = make_specs(use_buffered)
        return pl.pallas_call(
            _ffn_kernel,
            out_shape=jax.ShapeDtypeStruct((n_pad, C), x.dtype),
            grid=(n_pad // tm, n_h),
            in_specs=in_specs,
            out_specs=out_spec,
            scratch_shapes=[pltpu.VMEM((tm, C), jnp.float32)],
            compiler_params=pltpu.CompilerParams(
                dimension_semantics=("parallel", "arbitrary"),
                vmem_limit_bytes=vmem_limit),
        )(x2, w1b, b1f, w2b, b2f)

    try:
        out = jax.block_until_ready(run(use_buffered=True))
    except Exception:
        # pipeline_mode / pl.Buffered(1) not supported by this jax version:
        # fall back to default (double-buffered) specs so the kernel still runs.
        out = run(use_buffered=False)

    if n_pad != N:
        out = out[:N]
    return out.reshape(orig_shape)


def reference(x, w1, b1, w2, b2):
    """Pure-JAX f32 reference mirroring the PyTorch forward (dropout = identity)."""
    h = jnp.maximum(x @ w1 + b1, 0.0)
    return h @ w2 + b2


if __name__ == "__main__":
    # Small deterministic config consistent with the module:
    # x: (batch, seq, emb_dim); hidden = 4 * emb_dim.
    B, T, emb_dim = 2, 8, 32
    hidden = 4 * emb_dim  # 128

    key = jax.random.PRNGKey(0)
    kx, k1, kb1, k2, kb2 = jax.random.split(key, 5)

    x = jax.random.normal(kx, (B, T, emb_dim), jnp.float32)

    # Linear(emb_dim -> 4*emb_dim) stored transposed as (C, H) so h = x @ W1 + b1.
    w1 = 0.05 * jax.random.normal(k1, (emb_dim, hidden), jnp.float32)
    b1 = 0.05 * jax.random.normal(kb1, (1, hidden), jnp.float32)
    # Linear(4*emb_dim -> emb_dim) stored transposed as (H, C).
    w2 = 0.05 * jax.random.normal(k2, (hidden, emb_dim), jnp.float32)
    b2 = 0.05 * jax.random.normal(kb2, (1, emb_dim), jnp.float32)

    out = feedforward(x, w1, b1, w2, b2)
    out = jax.block_until_ready(out)

    ref = reference(x, w1, b1, w2, b2)
    assert out.shape == (B, T, emb_dim)
    # bf16 matmul inputs -> loosened tolerance vs. the f32 reference.
    assert jnp.allclose(out, ref, rtol=2e-2, atol=2e-2), "mismatch vs reference"

    print("KERNEL_OK")
</pallas_src>

<mosaic_0001>
module attributes {stable_mosaic.version = 11 : i64} {
  func.func @_ffn_kernel(%arg0: i32, %arg1: i32, %arg2: memref<8x32xf32, #tpu.memory_space<vmem>>, %arg3: memref<32x128xbf16, #tpu.memory_space<vmem>>, %arg4: memref<1x128xf32, #tpu.memory_space<vmem>>, %arg5: memref<128x32xbf16, #tpu.memory_space<vmem>>, %arg6: memref<1x32xf32, #tpu.memory_space<vmem>>, %arg7: memref<8x32xf32, #tpu.memory_space<vmem>>, %arg8: memref<8x32xf32, #tpu.memory_space<vmem>>) attributes {dimension_semantics = [#tpu.dimension_semantics<parallel>, #tpu.dimension_semantics<arbitrary>], iteration_bounds = array<i64: 2, 1>, scalar_prefetch = 0 : i64, scratch_operands = 1 : i64, tpu.core_type = #tpu.core_type<tc>, window_params = [{transform_indices = @transform_0, window_bounds = array<i64: 8, 32>}, {pipeline_mode = #tpu.pipeline_mode<synchronous>, transform_indices = @transform_1, window_bounds = array<i64: 32, 128>}, {pipeline_mode = #tpu.pipeline_mode<synchronous>, transform_indices = @transform_2, window_bounds = array<i64: 1, 128>}, {pipeline_mode = #tpu.pipeline_mode<synchronous>, transform_indices = @transform_3, window_bounds = array<i64: 128, 32>}, {pipeline_mode = #tpu.pipeline_mode<synchronous>, transform_indices = @transform_4, window_bounds = array<i64: 1, 32>}, {transform_indices = @transform_5, window_bounds = array<i64: 8, 32>}]} {
    %c0_i32 = arith.constant 0 : i32
    %0 = arith.cmpi eq, %arg1, %c0_i32 : i32
    %1 = arith.extui %0 : i1 to i32
    %c0_i32_0 = arith.constant 0 : i32
    %2 = arith.cmpi ne, %1, %c0_i32_0 : i32
    scf.if %2 {
      %cst_16 = arith.constant 0.000000e+00 : f32
      %21 = vector.broadcast %cst_16 : f32 to vector<8x32xf32>
      %c0_17 = arith.constant 0 : index
      %c0_18 = arith.constant 0 : index
      %22 = vector.load %arg8[%c0_17, %c0_18] : memref<8x32xf32, #tpu.memory_space<vmem>>, vector<8x32xf32>
      tpu.vector_store %arg8[%c0_17, %c0_18], %21 {strides = array<i32>} : memref<8x32xf32, #tpu.memory_space<vmem>>, vector<8x32xf32>,
    } else {
    }
    %c0 = arith.constant 0 : index
    %c0_1 = arith.constant 0 : index
    %3 = vector.load %arg2[%c0, %c0_1] : memref<8x32xf32, #tpu.memory_space<vmem>>, vector<8x32xf32>
    %4 = arith.truncf %3 : vector<8x32xf32> to vector<8x32xbf16>
    %c0_2 = arith.constant 0 : index
    %c0_3 = arith.constant 0 : index
    %5 = vector.load %arg3[%c0_2, %c0_3] : memref<32x128xbf16, #tpu.memory_space<vmem>>, vector<32x128xbf16>
    %cst = arith.constant dense<0.000000e+00> : vector<8x128xf32>
    %6 = tpu.matmul %4, %5, %cst {dimension_numbers = #tpu.dot_dimension_numbers<[1], [0], [0], [1], [0, 0, 1, 1], [], []>} : vector<8x32xbf16>, vector<32x128xbf16>, vector<8x128xf32> -> vector<8x128xf32>
    %c0_4 = arith.constant 0 : index
    %c0_5 = arith.constant 0 : index
    %7 = vector.load %arg4[%c0_4, %c0_5] : memref<1x128xf32, #tpu.memory_space<vmem>>, vector<1x128xf32>
    %8 = vector.broadcast %7 : vector<1x128xf32> to vector<8x128xf32>
    %9 = arith.addf %6, %8 : vector<8x128xf32>
    %cst_6 = arith.constant 0.000000e+00 : f32
    %10 = vector.broadcast %cst_6 : f32 to vector<8x128xf32>
    %11 = arith.maximumf %9, %10 : vector<8x128xf32>
    %c0_7 = arith.constant 0 : index
    %c0_8 = arith.constant 0 : index
    %12 = vector.load %arg8[%c0_7, %c0_8] : memref<8x32xf32, #tpu.memory_space<vmem>>, vector<8x32xf32>
    %13 = arith.truncf %11 : vector<8x128xf32> to vector<8x128xbf16>
    %c0_9 = arith.constant 0 : index
    %c0_10 = arith.constant 0 : index
    %14 = vector.load %arg5[%c0_9, %c0_10] : memref<128x32xbf16, #tpu.memory_space<vmem>>, vector<128x32xbf16>
    %cst_11 = arith.constant dense<0.000000e+00> : vector<8x32xf32>
    %15 = tpu.matmul %13, %14, %cst_11 {dimension_numbers = #tpu.dot_dimension_numbers<[1], [0], [0], [1], [0, 0, 1, 1], [], []>} : vector<8x128xbf16>, vector<128x32xbf16>, vector<8x32xf32> -> vector<8x32xf32>
    %16 = arith.addf %12, %15 : vector<8x32xf32>
    %c0_12 = arith.constant 0 : index
    %c0_13 = arith.constant 0 : index
    %17 = vector.load %arg8[%c0_12, %c0_13] : memref<8x32xf32, #tpu.memory_space<vmem>>, vector<8x32xf32>
    tpu.vector_store %arg8[%c0_12, %c0_13], %16 {strides = array<i32>} : memref<8x32xf32, #tpu.memory_space<vmem>>, vector<8x32xf32>,
    %c0_i32_14 = arith.constant 0 : i32
    %18 = arith.cmpi eq, %arg1, %c0_i32_14 : i32
    %19 = arith.extui %18 : i1 to i32
    %c0_i32_15 = arith.constant 0 : i32
    %20 = arith.cmpi ne, %19, %c0_i32_15 : i32
    scf.if %20 {
      %c0_16 = arith.constant 0 : index
      %c0_17 = arith.constant 0 : index
      %21 = vector.load %arg8[%c0_16, %c0_17] : memref<8x32xf32, #tpu.memory_space<vmem>>, vector<8x32xf32>
      %c0_18 = arith.constant 0 : index
      %c0_19 = arith.constant 0 : index
      %22 = vector.load %arg6[%c0_18, %c0_19] : memref<1x32xf32, #tpu.memory_space<vmem>>, vector<1x32xf32>
      %23 = vector.broadcast %22 : vector<1x32xf32> to vector<8x32xf32>
      %24 = arith.addf %21, %23 : vector<8x32xf32>
      %c0_20 = arith.constant 0 : index
      %c0_21 = arith.constant 0 : index
      %25 = vector.load %arg7[%c0_20, %c0_21] : memref<8x32xf32, #tpu.memory_space<vmem>>, vector<8x32xf32>
      tpu.vector_store %arg7[%c0_20, %c0_21], %24 {strides = array<i32>} : memref<8x32xf32, #tpu.memory_space<vmem>>, vector<8x32xf32>,
    } else {
    }
    return
  }
  func.func @transform_0(%arg0: i32, %arg1: i32) -> (i32, i32) {
    %c0_i32 = arith.constant 0 : i32
    %c0_i32_0 = arith.constant 0 : i32
    return %arg0, %c0_i32 : i32, i32
  }
  func.func @transform_1(%arg0: i32, %arg1: i32) -> (i32, i32) {
    %c0_i32 = arith.constant 0 : i32
    %c0_i32_0 = arith.constant 0 : i32
    return %c0_i32, %arg1 : i32, i32
  }
  func.func @transform_2(%arg0: i32, %arg1: i32) -> (i32, i32) {
    %c0_i32 = arith.constant 0 : i32
    %c0_i32_0 = arith.constant 0 : i32
    return %c0_i32, %arg1 : i32, i32
  }
  func.func @transform_3(%arg0: i32, %arg1: i32) -> (i32, i32) {
    %c0_i32 = arith.constant 0 : i32
    %c0_i32_0 = arith.constant 0 : i32
    return %arg1, %c0_i32 : i32, i32
  }
  func.func @transform_4(%arg0: i32, %arg1: i32) -> (i32, i32) {
    %c0_i32 = arith.constant 0 : i32
    %c0_i32_0 = arith.constant 0 : i32
    %c0_i32_1 = arith.constant 0 : i32
    return %c0_i32, %c0_i32_0 : i32, i32
  }
  func.func @transform_5(%arg0: i32, %arg1: i32) -> (i32, i32) {
    %c0_i32 = arith.constant 0 : i32
    %c0_i32_0 = arith.constant 0 : i32
    return %arg0, %c0_i32 : i32, i32
  }
}

module attributes {stable_mosaic.version = 11 : i64} {
  func.func @_ffn_kernel(%arg0: i32, %arg1: i32, %arg2: memref<8x32xf32, #tpu.memory_space<vmem>>, %arg3: memref<32x128xbf16, #tpu.memory_space<vmem>>, %arg4: memref<1x128xf32, #tpu.memory_space<vmem>>, %arg5: memref<128x32xbf16, #tpu.memory_space<vmem>>, %arg6: memref<1x32xf32, #tpu.memory_space<vmem>>, %arg7: memref<8x32xf32, #tpu.memory_space<vmem>>, %arg8: memref<8x32xf32, #tpu.memory_space<vmem>>) attributes {dimension_semantics = [#tpu.dimension_semantics<parallel>, #tpu.dimension_semantics<arbitrary>], iteration_bounds = array<i64: 2, 1>, scalar_prefetch = 0 : i64, scratch_operands = 1 : i64, tpu.core_type = #tpu.core_type<tc>, window_params = [{transform_indices = @transform_0, window_bounds = array<i64: 8, 32>}, {transform_indices = @transform_1, window_bounds = array<i64: 32, 128>}, {transform_indices = @transform_2, window_bounds = array<i64: 1, 128>}, {transform_indices = @transform_3, window_bounds = array<i64: 128, 32>}, {pipeline_mode = #tpu.pipeline_mode<synchronous>, transform_indices = @transform_4, window_bounds = array<i64: 1, 32>}, {transform_indices = @transform_5, window_bounds = array<i64: 8, 32>}]} {
    %c0_i32 = arith.constant 0 : i32
    %0 = arith.cmpi eq, %arg1, %c0_i32 : i32
    %1 = arith.extui %0 : i1 to i32
    %c0_i32_0 = arith.constant 0 : i32
    %2 = arith.cmpi ne, %1, %c0_i32_0 : i32
    scf.if %2 {
      %cst_16 = arith.constant 0.000000e+00 : f32
      %21 = vector.broadcast %cst_16 : f32 to vector<8x32xf32>
      %c0_17 = arith.constant 0 : index
      %c0_18 = arith.constant 0 : index
      %22 = vector.load %arg8[%c0_17, %c0_18] : memref<8x32xf32, #tpu.memory_space<vmem>>, vector<8x32xf32>
      tpu.vector_store %arg8[%c0_17, %c0_18], %21 {strides = array<i32>} : memref<8x32xf32, #tpu.memory_space<vmem>>, vector<8x32xf32>,
    } else {
    }
    %c0 = arith.constant 0 : index
    %c0_1 = arith.constant 0 : index
    %3 = vector.load %arg2[%c0, %c0_1] : memref<8x32xf32, #tpu.memory_space<vmem>>, vector<8x32xf32>
    %4 = arith.truncf %3 : vector<8x32xf32> to vector<8x32xbf16>
    %c0_2 = arith.constant 0 : index
    %c0_3 = arith.constant 0 : index
    %5 = vector.load %arg3[%c0_2, %c0_3] : memref<32x128xbf16, #tpu.memory_space<vmem>>, vector<32x128xbf16>
    %cst = arith.constant dense<0.000000e+00> : vector<8x128xf32>
    %6 = tpu.matmul %4, %5, %cst {dimension_numbers = #tpu.dot_dimension_numbers<[1], [0], [0], [1], [0, 0, 1, 1], [], []>} : vector<8x32xbf16>, vector<32x128xbf16>, vector<8x128xf32> -> vector<8x128xf32>
    %c0_4 = arith.constant 0 : index
    %c0_5 = arith.constant 0 : index
    %7 = vector.load %arg4[%c0_4, %c0_5] : memref<1x128xf32, #tpu.memory_space<vmem>>, vector<1x128xf32>
    %8 = vector.broadcast %7 : vector<1x128xf32> to vector<8x128xf32>
    %9 = arith.addf %6, %8 : vector<8x128xf32>
    %cst_6 = arith.constant 0.000000e+00 : f32
    %10 = vector.broadcast %cst_6 : f32 to vector<8x128xf32>
    %11 = arith.maximumf %9, %10 : vector<8x128xf32>
    %c0_7 = arith.constant 0 : index
    %c0_8 = arith.constant 0 : index
    %12 = vector.load %arg8[%c0_7, %c0_8] : memref<8x32xf32, #tpu.memory_space<vmem>>, vector<8x32xf32>
    %13 = arith.truncf %11 : vector<8x128xf32> to vector<8x128xbf16>
    %c0_9 = arith.constant 0 : index
    %c0_10 = arith.constant 0 : index
    %14 = vector.load %arg5[%c0_9, %c0_10] : memref<128x32xbf16, #tpu.memory_space<vmem>>, vector<128x32xbf16>
    %cst_11 = arith.constant dense<0.000000e+00> : vector<8x32xf32>
    %15 = tpu.matmul %13, %14, %cst_11 {dimension_numbers = #tpu.dot_dimension_numbers<[1], [0], [0], [1], [0, 0, 1, 1], [], []>} : vector<8x128xbf16>, vector<128x32xbf16>, vector<8x32xf32> -> vector<8x32xf32>
    %16 = arith.addf %12, %15 : vector<8x32xf32>
    %c0_12 = arith.constant 0 : index
    %c0_13 = arith.constant 0 : index
    %17 = vector.load %arg8[%c0_12, %c0_13] : memref<8x32xf32, #tpu.memory_space<vmem>>, vector<8x32xf32>
    tpu.vector_store %arg8[%c0_12, %c0_13], %16 {strides = array<i32>} : memref<8x32xf32, #tpu.memory_space<vmem>>, vector<8x32xf32>,
    %c0_i32_14 = arith.constant 0 : i32
    %18 = arith.cmpi eq, %arg1, %c0_i32_14 : i32
    %19 = arith.extui %18 : i1 to i32
    %c0_i32_15 = arith.constant 0 : i32
    %20 = arith.cmpi ne, %19, %c0_i32_15 : i32
    scf.if %20 {
      %c0_16 = arith.constant 0 : index
      %c0_17 = arith.constant 0 : index
      %21 = vector.load %arg8[%c0_16, %c0_17] : memref<8x32xf32, #tpu.memory_space<vmem>>, vector<8x32xf32>
      %c0_18 = arith.constant 0 : index
      %c0_19 = arith.constant 0 : index
      %22 = vector.load %arg6[%c0_18, %c0_19] : memref<1x32xf32, #tpu.memory_space<vmem>>, vector<1x32xf32>
      %23 = vector.broadcast %22 : vector<1x32xf32> to vector<8x32xf32>
      %24 = arith.addf %21, %23 : vector<8x32xf32>
      %c0_20 = arith.constant 0 : index
      %c0_21 = arith.constant 0 : index
      %25 = vector.load %arg7[%c0_20, %c0_21] : memref<8x32xf32, #tpu.memory_space<vmem>>, vector<8x32xf32>
      tpu.vector_store %arg7[%c0_20, %c0_21], %24 {strides = array<i32>} : memref<8x32xf32, #tpu.memory_space<vmem>>, vector<8x32xf32>,
    } else {
    }
    return
  }
  func.func @transform_0(%arg0: i32, %arg1: i32) -> (i32, i32) {
    %c0_i32 = arith.constant 0 : i32
    %c0_i32_0 = arith.constant 0 : i32
    return %arg0, %c0_i32 : i32, i32
  }
  func.func @transform_1(%arg0: i32, %arg1: i32) -> (i32, i32) {
    %c0_i32 = arith.constant 0 : i32
    %c0_i32_0 = arith.constant 0 : i32
    return %c0_i32, %arg1 : i32, i32
  }
  func.func @transform_2(%arg0: i32, %arg1: i32) -> (i32, i32) {
    %c0_i32 = arith.constant 0 : i32
    %c0_i32_0 = arith.constant 0 : i32
    return %c0_i32, %arg1 : i32, i32
  }
  func.func @transform_3(%arg0: i32, %arg1: i32) -> (i32, i32) {
    %c0_i32 = arith.constant 0 : i32
    %c0_i32_0 = arith.constant 0 : i32
    return %arg1, %c0_i32 : i32, i32
  }
  func.func @transform_4(%arg0: i32, %arg1: i32) -> (i32, i32) {
    %c0_i32 = arith.constant 0 : i32
    %c0_i32_0 = arith.constant 0 : i32
    %c0_i32_1 = arith.constant 0 : i32
    return %c0_i32, %c0_i32_0 : i32, i32
  }
  func.func @transform_5(%arg0: i32, %arg1: i32) -> (i32, i32) {
    %c0_i32 = arith.constant 0 : i32
    %c0_i32_0 = arith.constant 0 : i32
    return %arg0, %c0_i32 : i32, i32
  }
}

</mosaic_0001>

<bundles_post_ra>
// kernel: tpu_custom_call.1
= control target key start
LH: loop header
LB: loop body
LE: loop exit
PB: predicated region body
PF: predicated region fallthrough
CT: control target
= control target key end

     0   :  { %10 = vsyncpa [#allocation4], 0  ;;  %s919_s0 = inlined_call_operand.vmem [shape: f32[16,32], index: 0, kind: input, shape index: {}]   ;;  %s920_s1 = inlined_call_operand.vmem [shape: bf16[32,128], index: 1, kind: input, shape index: {}]   ;;  %s921_s2 = inlined_call_operand.vmem [shape: f32[1,128], index: 2, kind: input, shape index: {}]   ;;  %s922_s3 = inlined_call_operand.vmem [shape: bf16[128,32], index: 3, kind: input, shape index: {}]   ;;  %s923_s4 = inlined_call_operand.vmem [shape: f32[1,32], index: 4, kind: input, shape index: {}]   ;;  %s924_s5 = inlined_call_operand.hbm [shape: f32[16,32], index: 5, kind: output, shape index: {}]  }
   0x1   :  { %12 = vsyncpa [#allocation4 + $0x1], 0  ;;  %s782_s18 = smov 0   ;;  %s784_s19 = smov 0  }
   0x2   :  { %s786_s20 = smov 0   ;;  %s788_s21 = smov 0  }
   0x3   :  { %s790_s22 = smov 0   ;;  %s792_s23 = smov 0  }
   0x4 LB: > { %s548_s24 = sadd.s32 4294967295, %s749_s23   ;;  %s549_s25 = sadd.s32 4294967294, %s749_s23   ;;  %s749_s23 = sphi %s792_s23, %s18_s23   ;;  %s745_s22 = sphi %s790_s22, %s931_s22   ;;  %s741_s21 = sphi %s788_s21, %s930_s21   ;;  %s737_s20 = sphi %s786_s20, %s929_s20   ;;  %s733_s19 = sphi %s784_s19, %s928_s19   ;;  %s729_s18 = sphi %s782_s18, %s927_s18  }
   0x5   : > { %s30_s26 = sadd.s32 1, %s745_s22  ;;  %s162_s27 = sadd.s32 1, %s737_s20 }
   0x6   : > { %p32_p0 = scmp.ge.s32.totalorder %s30_s26, 2  ;;  %p172_p1 = scmp.ne.s32.totalorder %s737_s20, %s733_s19 }
   0x7   : > { %p173_p2 = scmp.eq.s32.totalorder %s548_s24, 1  ;;  %p178_p3 = scmp.ne.s32.totalorder %s733_s19, %s729_s18 }
   0x8   : > { %s933_s26 = smov (%p32_p0, %s30_s26), 0  ;;  %p179_p5 = scmp.eq.s32.totalorder %s549_s25, 1 }
   0x9   : > { %p822_p4 = por %p173_p2, %p172_p1  ;;  %s159_s29 = ssub.s32 %s745_s22, %s933_s26 }
   0xa   : > { %p555_p6 = scmp.ge.s32.totalorder %s749_s23, 1  ;;  %p160_p7 = scmp.eq.s32.totalorder %s159_s29, 0 }
   0xb   : > { %p829_p8 = por %p179_p5, %p178_p3  ;;  %p229_p9 = scmp.lt.s32.totalorder %s749_s23, 3 }
   0xc   : > { %s835_s6 = scalar_select %p160_p7, %s737_s20, %s162_s27  }
   0xd   : > { %p230_p10 = pnand %p555_p6, %p229_p9 }
   0xe   : > { %p268_p11 = scmp.lt.s32.totalorder (!%p230_p10), %s741_s21, 1  ;;  %s600_s29 = sshll.u32 (!%p230_p10), %s741_s21, 3 }
   0xf   : > { %233 = sbr.rel (%p230_p10) target bundleno = 301 (0x12d), region = 40  ;;  %s434_s9 = scalar_lea.hbm (!%p230_p10), %s924_s5, %s600_s29 }
  0x10   : > { %s438_s14 = sshll.u32 (!%p230_p10), %s434_s9, 4  ;;  %s439_s14 = int_to_ptr.hbm [resolvable:$true] %s438_s14 }
  0x11   : > { %s685_s15 = sshra.s32 (!%p230_p10), %s439_s14, 4  ;;  %s686_s15 = int_to_ptr.hbm [resolvable:$true] %s685_s15 }
  0x12   : > { %p692_p1 = scmp.lt.s32.totalorder (!%p230_p10), %s686_s15, %s924_s5 }
  0x14   : > { %v604_v0 = vld [vmem:[%s920_s1 + $0x8] sm:$0xff]  ;;  %vm290_vm0 = vcmask 261120   ;;  %v612_v1 = vld [vmem:[%s922_s3 + $0x38] sm:$0xff]  ;;  %v751_v2 = vmov 0.0   ;;  %v603_v3 = vld [vmem:[%s920_s1] sm:$0xff]  ;;  %s269_s13 = scalar_select %p268_p11, %s741_s21, 1 }
  0x15   : > { %291 = vst.msk [vmem:[#allocation2] sm:$0xff] %vm290_vm0, %v751_v2  ;;  %324 = vmatpush.bf16.msra.mxu0 %v604_v0  ;;  %398 = vmatpush.bf16.msra.mxu1 %v612_v1  ;;  %v611_v4 = vld [vmem:[%s922_s3 + $0x30] sm:$0xff]  ;;  %v610_v6 = vld [vmem:[%s922_s3 + $0x28] sm:$0xff]  ;;  %v609_v8 = vld [vmem:[%s922_s3 + $0x20] sm:$0xff] }
  0x16   : > { %s557_s16 = sshll.u32 %s269_s13, 3  ;;  %v608_v9 = vld [vmem:[%s922_s3 + $0x18] sm:$0xff]  ;;  %v607_v10 = vld [vmem:[%s922_s3 + $0x10] sm:$0xff]  ;;  %v606_v11 = vld [vmem:[%s922_s3 + $0x8] sm:$0xff] }
  0x17   : > { %s271_s25 = scalar_lea.vmem %s919_s0, %s557_s16  ;;  %v605_v12 = vld [vmem:[%s922_s3] sm:$0xff]  ;;  %s687_s16 = scalar_lea.hbm %s686_s15, 8 }
  0x18   : > { %v292_v5 = vld [vmem:[%s271_s25] sm:$0xff]  ;;  %s265_s25 = sand.u32 1, %s733_s19   ;;  %p688_p12 = scmp.ne.s32.totalorder %s686_s15, %s687_s16 }
  0x19   : > { %325 = vmatpush.bf16.msra.mxu0 %v603_v3  ;;  %399 = vmatpush.bf16.msra.mxu1 %v611_v4  ;;  %v293_v7 = vpack.c.bf16 %v292_v5, %v292_v5  ;;  %v669_v13 = vld [vmem:[%s921_s2] ss:$0 sm:$0xff]  ;;  %s556_s27 = sshll.u32 %s265_s25, 3  ;;  %s424_s21 = scalar_lea.sflag [#allocation4], %s265_s25 }
  0x1a   : > { %v670_v22 = vld [vmem:[%s923_s4] ss:$0 sm:$0xff]  ;;  %s267_s12 = scalar_lea.vmem [#allocation3], %s556_s27  ;;  %p689_p13 = pnand %p688_p12, %p822_p4 }
  0x1b   : > { %s436_s13 = sshll.u32 %s267_s12, 4  ;;  %s691_s27 = scalar_lea.hbm %s924_s5, 16  ;;  %s437_s13 = int_to_ptr.vmem [resolvable:$true] %s436_s13 }
  0x1c   : > { %566 = vmatmul.msk.bf16.vlgmr.msra.gmra.mxu0 %vm290_vm0, %v293_v7  ;;  %v332_v19 = vld [vmem:[#allocation2] sm:$0xff]  ;;  %p690_p0 = pneg %p689_p13  ;;  %p693_p2 = scmp.lt.s32.totalorder %s691_s27, %s687_s16 }
  0x1d   : > { %400 = vmatpush.bf16.msra.mxu1 %v610_v6 }
  0x1e   : > { %p694_p3 = por %p693_p2, %p692_p1 }
  0x20   : > { %p695_p5 = pnand %p694_p3, %p690_p0 }
  0x21   : > { %401 = vmatpush.bf16.msra.mxu1 %v609_v8 }
  0x25   : > { %402 = vmatpush.bf16.msra.mxu1 %v608_v9 }
  0x29   : > { %403 = vmatpush.bf16.msra.mxu1 %v607_v10 }
  0x2d   : > { %404 = vmatpush.bf16.msra.mxu1 %v606_v11 }
  0x31   : > { %405 = vmatpush.bf16.msra.mxu1 %v605_v12 }
  0x99   : > { %v327_v14 = vpop.f32.mrf.mxu0 }
  0x9a   : > { %v328_v15 = vadd.f32 %v669_v13, %v327_v14 }
  0x9c   : > { %v331_v16 = vmax.f32 %v328_v15, 0.0 }
  0x9e   : > { %v333_v17 = vpack.c.bf16 %v331_v16, %v331_v16 }
  0xa0   : > { %406 = vmatmul.bf16.vlgmr.msra.gmra.mxu1 %v333_v17 }
  0xa1   : > { %v329_v18 = vpop.f32.mrf.mxu0 }
 0x11d   : > { %v407_v20 = vpop.f32.mrf.mxu1 }
 0x11e   : > { %v411_v21 = vadd.f32 %v407_v20, %v332_v19 }
 0x120   : > { %412 = vst.msk [vmem:[#allocation2] sm:$0xff] %vm290_vm0, %v411_v21 }
 0x125   : > { %v409_v23 = vpop.f32.mrf.mxu1 }
 0x127   : > { %v416_v24 = vld [vmem:[#allocation2] sm:$0xff] }
 0x128   : > { %v421_v25 = vadd.f32 %v670_v22, %v416_v24 }
 0x12a   : > { %422 = vst.msk [vmem:[%s267_s12] sm:$0xff] %vm290_vm0, %v421_v25 }
 0x12b   : > { %698 = shalt.err (!%p695_p5)
}
 0x12c   : > { %613 = dma.vmem_to_hbm [thread:$0]  (%p822_p4), %s437_s13, 128, %s439_s14, %s424_s21  }
 0x12d PF: > { %p619_p6 = scmp.ge.s32.totalorder %s749_s23, 2  ;;  %s450_s25 = sand.u32 1, %s729_s18  }
 0x12e   : > { %s451_s8 = scalar_lea.sflag [#allocation4], %s450_s25 }
 0x12f   : > { %p616_p7 = pnand %p619_p6, %p829_p8 }
 0x131   : > { %p617_p9 = pneg %p616_p7 }
 0x133   : > { %724 = dma.done.wait (%p617_p9), %s451_s8, 128  }
 0x134   : > { %726 = vsyncadd (%p617_p9), %s451_s8, 4294967168  ;;  %s18_s23 = sadd.s32 1, %s749_s23   ;;  %s927_s18 = smov %s733_s19 }
 0x135   : > { %p15_p10 = scmp.ge.s32.totalorder %s18_s23, 4   ;;  %s928_s19 = smov %s737_s20 }
 0x136   : > { %s929_s20 = smov %s835_s6  ;;  %s930_s21 = smov %s745_s22 }
 0x137   : > { %s931_s22 = smov %s933_s26  ;;  %17 = sbr.rel (!%p15_p10) target bundleno = 4 (0x4), region = 92 }
 0x13c   :  { %457 = vsyncpa [#allocation4], 1 }
 0x13d   :  { %459 = vsyncpa [#allocation4 + $0x1], 1 }

// kernel: tpu_custom_call.1
= control target key start
LH: loop header
LB: loop body
LE: loop exit
PB: predicated region body
PF: predicated region fallthrough
CT: control target
= control target key end

     0   :  { %10 = vsyncpa [#allocation4], 0  ;;  %s919_s0 = inlined_call_operand.vmem [shape: f32[16,32], index: 0, kind: input, shape index: {}]   ;;  %s920_s1 = inlined_call_operand.vmem [shape: bf16[32,128], index: 1, kind: input, shape index: {}]   ;;  %s921_s2 = inlined_call_operand.vmem [shape: f32[1,128], index: 2, kind: input, shape index: {}]   ;;  %s922_s3 = inlined_call_operand.vmem [shape: bf16[128,32], index: 3, kind: input, shape index: {}]   ;;  %s923_s4 = inlined_call_operand.vmem [shape: f32[1,32], index: 4, kind: input, shape index: {}]   ;;  %s924_s5 = inlined_call_operand.hbm [shape: f32[16,32], index: 5, kind: output, shape index: {}]  }
   0x1   :  { %12 = vsyncpa [#allocation4 + $0x1], 0  ;;  %s782_s18 = smov 0   ;;  %s784_s19 = smov 0  }
   0x2   :  { %s786_s20 = smov 0   ;;  %s788_s21 = smov 0  }
   0x3   :  { %s790_s22 = smov 0   ;;  %s792_s23 = smov 0  }
   0x4 LB: > { %s548_s24 = sadd.s32 4294967295, %s749_s23   ;;  %s549_s25 = sadd.s32 4294967294, %s749_s23   ;;  %s749_s23 = sphi %s792_s23, %s18_s23   ;;  %s745_s22 = sphi %s790_s22, %s931_s22   ;;  %s741_s21 = sphi %s788_s21, %s930_s21   ;;  %s737_s20 = sphi %s786_s20, %s929_s20   ;;  %s733_s19 = sphi %s784_s19, %s928_s19   ;;  %s729_s18 = sphi %s782_s18, %s927_s18  }
   0x5   : > { %s30_s26 = sadd.s32 1, %s745_s22  ;;  %s162_s27 = sadd.s32 1, %s737_s20 }
   0x6   : > { %p32_p0 = scmp.ge.s32.totalorder %s30_s26, 2  ;;  %p172_p1 = scmp.ne.s32.totalorder %s737_s20, %s733_s19 }
   0x7   : > { %p173_p2 = scmp.eq.s32.totalorder %s548_s24, 1  ;;  %p178_p3 = scmp.ne.s32.totalorder %s733_s19, %s729_s18 }
   0x8   : > { %s933_s26 = smov (%p32_p0, %s30_s26), 0  ;;  %p179_p5 = scmp.eq.s32.totalorder %s549_s25, 1 }
   0x9   : > { %p822_p4 = por %p173_p2, %p172_p1  ;;  %s159_s29 = ssub.s32 %s745_s22, %s933_s26 }
   0xa   : > { %p555_p6 = scmp.ge.s32.totalorder %s749_s23, 1  ;;  %p160_p7 = scmp.eq.s32.totalorder %s159_s29, 0 }
   0xb   : > { %p829_p8 = por %p179_p5, %p178_p3  ;;  %p229_p9 = scmp.lt.s32.totalorder %s749_s23, 3 }
   0xc   : > { %s835_s6 = scalar_select %p160_p7, %s737_s20, %s162_s27  }
   0xd   : > { %p230_p10 = pnand %p555_p6, %p229_p9 }
   0xe   : > { %p268_p11 = scmp.lt.s32.totalorder (!%p230_p10), %s741_s21, 1  ;;  %s600_s29 = sshll.u32 (!%p230_p10), %s741_s21, 3 }
   0xf   : > { %233 = sbr.rel (%p230_p10) target bundleno = 301 (0x12d), region = 40  ;;  %s434_s9 = scalar_lea.hbm (!%p230_p10), %s924_s5, %s600_s29 }
  0x10   : > { %s438_s14 = sshll.u32 (!%p230_p10), %s434_s9, 4  ;;  %s439_s14 = int_to_ptr.hbm [resolvable:$true] %s438_s14 }
  0x11   : > { %s685_s15 = sshra.s32 (!%p230_p10), %s439_s14, 4  ;;  %s686_s15 = int_to_ptr.hbm [resolvable:$true] %s685_s15 }
  0x12   : > { %p692_p1 = scmp.lt.s32.totalorder (!%p230_p10), %s686_s15, %s924_s5 }
  0x14   : > { %v604_v0 = vld [vmem:[%s920_s1 + $0x8] sm:$0xff]  ;;  %vm290_vm0 = vcmask 261120   ;;  %v612_v1 = vld [vmem:[%s922_s3 + $0x38] sm:$0xff]  ;;  %v751_v2 = vmov 0.0   ;;  %v603_v3 = vld [vmem:[%s920_s1] sm:$0xff]  ;;  %s269_s13 = scalar_select %p268_p11, %s741_s21, 1 }
  0x15   : > { %291 = vst.msk [vmem:[#allocation2] sm:$0xff] %vm290_vm0, %v751_v2  ;;  %324 = vmatpush.bf16.msra.mxu0 %v604_v0  ;;  %398 = vmatpush.bf16.msra.mxu1 %v612_v1  ;;  %v611_v4 = vld [vmem:[%s922_s3 + $0x30] sm:$0xff]  ;;  %v610_v6 = vld [vmem:[%s922_s3 + $0x28] sm:$0xff]  ;;  %v609_v8 = vld [vmem:[%s922_s3 + $0x20] sm:$0xff] }
  0x16   : > { %s557_s16 = sshll.u32 %s269_s13, 3  ;;  %v608_v9 = vld [vmem:[%s922_s3 + $0x18] sm:$0xff]  ;;  %v607_v10 = vld [vmem:[%s922_s3 + $0x10] sm:$0xff]  ;;  %v606_v11 = vld [vmem:[%s922_s3 + $0x8] sm:$0xff] }
  0x17   : > { %s271_s25 = scalar_lea.vmem %s919_s0, %s557_s16  ;;  %v605_v12 = vld [vmem:[%s922_s3] sm:$0xff]  ;;  %s687_s16 = scalar_lea.hbm %s686_s15, 8 }
  0x18   : > { %v292_v5 = vld [vmem:[%s271_s25] sm:$0xff]  ;;  %s265_s25 = sand.u32 1, %s733_s19   ;;  %p688_p12 = scmp.ne.s32.totalorder %s686_s15, %s687_s16 }
  0x19   : > { %325 = vmatpush.bf16.msra.mxu0 %v603_v3  ;;  %399 = vmatpush.bf16.msra.mxu1 %v611_v4  ;;  %v293_v7 = vpack.c.bf16 %v292_v5, %v292_v5  ;;  %v669_v13 = vld [vmem:[%s921_s2] ss:$0 sm:$0xff]  ;;  %s556_s27 = sshll.u32 %s265_s25, 3  ;;  %s424_s21 = scalar_lea.sflag [#allocation4], %s265_s25 }
  0x1a   : > { %v670_v22 = vld [vmem:[%s923_s4] ss:$0 sm:$0xff]  ;;  %s267_s12 = scalar_lea.vmem [#allocation3], %s556_s27  ;;  %p689_p13 = pnand %p688_p12, %p822_p4 }
  0x1b   : > { %s436_s13 = sshll.u32 %s267_s12, 4  ;;  %s691_s27 = scalar_lea.hbm %s924_s5, 16  ;;  %s437_s13 = int_to_ptr.vmem [resolvable:$true] %s436_s13 }
  0x1c   : > { %566 = vmatmul.msk.bf16.vlgmr.msra.gmra.mxu0 %vm290_vm0, %v293_v7  ;;  %v332_v19 = vld [vmem:[#allocation2] sm:$0xff]  ;;  %p690_p0 = pneg %p689_p13  ;;  %p693_p2 = scmp.lt.s32.totalorder %s691_s27, %s687_s16 }
  0x1d   : > { %400 = vmatpush.bf16.msra.mxu1 %v610_v6 }
  0x1e   : > { %p694_p3 = por %p693_p2, %p692_p1 }
  0x20   : > { %p695_p5 = pnand %p694_p3, %p690_p0 }
  0x21   : > { %401 = vmatpush.bf16.msra.mxu1 %v609_v8 }
  0x25   : > { %402 = vmatpush.bf16.msra.mxu1 %v608_v9 }
  0x29   : > { %403 = vmatpush.bf16.msra.mxu1 %v607_v10 }
  0x2d   : > { %404 = vmatpush.bf16.msra.mxu1 %v606_v11 }
  0x31   : > { %405 = vmatpush.bf16.msra.mxu1 %v605_v12 }
  0x99   : > { %v327_v14 = vpop.f32.mrf.mxu0 }
  0x9a   : > { %v328_v15 = vadd.f32 %v669_v13, %v327_v14 }
  0x9c   : > { %v331_v16 = vmax.f32 %v328_v15, 0.0 }
  0x9e   : > { %v333_v17 = vpack.c.bf16 %v331_v16, %v331_v16 }
  0xa0   : > { %406 = vmatmul.bf16.vlgmr.msra.gmra.mxu1 %v333_v17 }
  0xa1   : > { %v329_v18 = vpop.f32.mrf.mxu0 }
 0x11d   : > { %v407_v20 = vpop.f32.mrf.mxu1 }
 0x11e   : > { %v411_v21 = vadd.f32 %v407_v20, %v332_v19 }
 0x120   : > { %412 = vst.msk [vmem:[#allocation2] sm:$0xff] %vm290_vm0, %v411_v21 }
 0x125   : > { %v409_v23 = vpop.f32.mrf.mxu1 }
 0x127   : > { %v416_v24 = vld [vmem:[#allocation2] sm:$0xff] }
 0x128   : > { %v421_v25 = vadd.f32 %v670_v22, %v416_v24 }
 0x12a   : > { %422 = vst.msk [vmem:[%s267_s12] sm:$0xff] %vm290_vm0, %v421_v25 }
 0x12b   : > { %698 = shalt.err (!%p695_p5)
}
 0x12c   : > { %613 = dma.vmem_to_hbm [thread:$0]  (%p822_p4), %s437_s13, 128, %s439_s14, %s424_s21  }
 0x12d PF: > { %p619_p6 = scmp.ge.s32.totalorder %s749_s23, 2  ;;  %s450_s25 = sand.u32 1, %s729_s18  }
 0x12e   : > { %s451_s8 = scalar_lea.sflag [#allocation4], %s450_s25 }
 0x12f   : > { %p616_p7 = pnand %p619_p6, %p829_p8 }
 0x131   : > { %p617_p9 = pneg %p616_p7 }
 0x133   : > { %724 = dma.done.wait (%p617_p9), %s451_s8, 128  }
 0x134   : > { %726 = vsyncadd (%p617_p9), %s451_s8, 4294967168  ;;  %s18_s23 = sadd.s32 1, %s749_s23   ;;  %s927_s18 = smov %s733_s19 }
 0x135   : > { %p15_p10 = scmp.ge.s32.totalorder %s18_s23, 4   ;;  %s928_s19 = smov %s737_s20 }
 0x136   : > { %s929_s20 = smov %s835_s6  ;;  %s930_s21 = smov %s745_s22 }
 0x137   : > { %s931_s22 = smov %s933_s26  ;;  %17 = sbr.rel (!%p15_p10) target bundleno = 4 (0x4), region = 92 }
 0x13c   :  { %457 = vsyncpa [#allocation4], 1 }
 0x13d   :  { %459 = vsyncpa [#allocation4 + $0x1], 1 }

</bundles_post_ra>
